<compile_context>
chip_gen: v6e
topology: v6e:2x2x1
jax: 0.10.0
libtpu: 0.0.40
codegen_flags: <defaults>
</compile_context>

<pallas_src>
import functools

import jax
import jax.numpy as jnp
from jax.experimental import pallas as pl
from jax.experimental.pallas import tpu as pltpu

LANE = 128        # lane width (f32/bf16)
ROW_ALIGN = 16    # bf16 packs 2 rows per sublane -> keep tiles a multiple of 16


def _round_up(x, m):
    return ((x + m - 1) // m) * m


def _cdiv(a, b):
    return -(-a // b)


# ----------------------------------------------------------------------------
# Kernel
# ----------------------------------------------------------------------------
def _encoder_kernel(x_ref, w1_ref, t1_ref, w2_ref, t2_ref, o_ref, *, output_size):
    # Cast the streamed f32 x tile to bf16 in-kernel (cheap VPU op, removes the
    # out-of-kernel cast pass).
    x = x_ref[...].astype(jnp.bfloat16)

    # Layer 1: Linear + BN(eval) + ReLU (bias & BN scale pre-folded into w1/t1).
    h = jnp.dot(x, w1_ref[...], preferred_element_type=jnp.float32)
    h = jnp.maximum(h + t1_ref[...], 0.0)            # Dropout -> identity (eval)

    # Layer 2: Linear + BN(eval) + ReLU.
    y = jnp.dot(h.astype(w2_ref.dtype), w2_ref[...],
                preferred_element_type=jnp.float32)
    y = jnp.maximum(y + t2_ref[...], 0.0)            # Dropout -> identity (eval)

    # Store only the real output columns (padded lanes never reach HBM).
    o_ref[...] = y[:, :output_size].astype(o_ref.dtype)


# ----------------------------------------------------------------------------
# Wrapper
# ----------------------------------------------------------------------------
def _choose_tm(n, tm_max=2048):
    """Batch tile: single 16-aligned tile for small batches; otherwise a
    256-aligned tile sized so the grid has >= ~8 steps, capped by tm_max."""
    if n <= 256:
        return max(ROW_ALIGN, _round_up(n, ROW_ALIGN))
    tm = _round_up(_cdiv(n, 8), 256)
    return min(max(tm, 256), tm_max)


def probes_encoder_forward(x, kparams, output_size, *, tm_max=2048):
    """x: (N, input_size) f32.  kparams: folded/padded params from
    fold_and_pad_params().  Returns (N, output_size) f32."""
    n, in_features = x.shape
    hp = kparams["w1"].shape[1]       # padded hidden (multiple of 128)
    op = kparams["w2"].shape[1]       # padded output (multiple of 128)

    tm = _choose_tm(n, tm_max)
    grid = (_cdiv(n, tm),)            # partial last block OK (rows independent)

    cost = pl.CostEstimate(
        flops=2 * n * (in_features * hp + hp * op),
        transcendentals=0,
        bytes_accessed=(n * in_features * 4                 # x (f32, read)
                        + in_features * hp * 2 + hp * op * 2  # weights (bf16)
                        + (hp + op) * 4                        # folded shifts
                        + n * output_size * 4),                # output (f32)
    )

    kernel = functools.partial(_encoder_kernel, output_size=output_size)

    out = pl.pallas_call(
        kernel,
        out_shape=jax.ShapeDtypeStruct((n, output_size), jnp.float32),
        grid=grid,
        in_specs=[
            pl.BlockSpec((tm, in_features), lambda i: (i, 0)),   # x (streamed)
            pl.BlockSpec((in_features, hp), lambda i: (0, 0)),   # W1' (resident)
            pl.BlockSpec((1, hp),           lambda i: (0, 0)),   # t1'
            pl.BlockSpec((hp, op),          lambda i: (0, 0)),   # W2' (resident)
            pl.BlockSpec((1, op),           lambda i: (0, 0)),   # t2'
        ],
        out_specs=pl.BlockSpec((tm, output_size), lambda i: (i, 0)),
        compiler_params=pltpu.CompilerParams(
            dimension_semantics=("parallel",)),
        cost_estimate=cost,
    )(x, kparams["w1"], kparams["t1"], kparams["w2"], kparams["t2"])

    return out


# ----------------------------------------------------------------------------
# Parameter construction (synthetic, mirrors the PyTorch module's shapes)
# ----------------------------------------------------------------------------
def make_raw_params(key, input_size, hidden_size, output_size):
    ks = jax.random.split(key, 12)

    def uniform(k, shape, fan_in):
        bound = 1.0 / jnp.sqrt(fan_in)
        return jax.random.uniform(k, shape, jnp.float32, -bound, bound)

    # Linear layers, stored transposed vs PyTorch: (in, out).
    w1 = uniform(ks[0], (input_size, hidden_size), input_size)
    b1 = uniform(ks[1], (1, hidden_size), input_size)
    w2 = uniform(ks[2], (hidden_size, output_size), hidden_size)
    b2 = uniform(ks[3], (1, output_size), hidden_size)

    # BatchNorm1d params and running stats (eval mode) — nontrivial values.
    g1 = 1.0 + 0.1 * jax.random.normal(ks[4], (1, hidden_size), jnp.float32)
    beta1 = 0.1 * jax.random.normal(ks[5], (1, hidden_size), jnp.float32)
    rm1 = 0.1 * jax.random.normal(ks[6], (1, hidden_size), jnp.float32)
    rv1 = 1.0 + 0.1 * jax.random.uniform(ks[7], (1, hidden_size), jnp.float32)

    g2 = 1.0 + 0.1 * jax.random.normal(ks[8], (1, output_size), jnp.float32)
    beta2 = 0.1 * jax.random.normal(ks[9], (1, output_size), jnp.float32)
    rm2 = 0.1 * jax.random.normal(ks[10], (1, output_size), jnp.float32)
    rv2 = 1.0 + 0.1 * jax.random.uniform(ks[11], (1, output_size), jnp.float32)

    return dict(w1=w1, b1=b1, w2=w2, b2=b2,
                g1=g1, beta1=beta1, rm1=rm1, rv1=rv1,
                g2=g2, beta2=beta2, rm2=rm2, rv2=rv2)


def fold_and_pad_params(raw, eps=1e-5):
    """Fold Linear bias + eval BatchNorm into (W', t'); zero-pad feature dims
    to multiples of 128 so intermediates are lane-dense / MXU-native."""
    s1 = raw["g1"] / jnp.sqrt(raw["rv1"] + eps)
    t1 = raw["beta1"] - raw["rm1"] * s1 + raw["b1"] * s1
    w1 = raw["w1"] * s1                          # column-wise scale

    s2 = raw["g2"] / jnp.sqrt(raw["rv2"] + eps)
    t2 = raw["beta2"] - raw["rm2"] * s2 + raw["b2"] * s2
    w2 = raw["w2"] * s2

    hid, out = w1.shape[1], w2.shape[1]
    hp, op = _round_up(hid, LANE), _round_up(out, LANE)

    w1p = jnp.zeros((w1.shape[0], hp), jnp.float32).at[:, :hid].set(w1)
    t1p = jnp.zeros((1, hp), jnp.float32).at[:, :hid].set(t1)
    w2p = jnp.zeros((hp, op), jnp.float32).at[:hid, :out].set(w2)
    t2p = jnp.zeros((1, op), jnp.float32).at[:, :out].set(t2)

    # bf16 operands for the MXU; shifts stay f32 (added to the f32 accumulator).
    return dict(w1=w1p.astype(jnp.bfloat16), t1=t1p,
                w2=w2p.astype(jnp.bfloat16), t2=t2p)


# ----------------------------------------------------------------------------
# References
# ----------------------------------------------------------------------------
def reference_f32(x, raw, eps=1e-5):
    """Plain f32 eval-mode forward of the original module (no folding)."""
    h = x @ raw["w1"] + raw["b1"]
    h = (h - raw["rm1"]) / jnp.sqrt(raw["rv1"] + eps) * raw["g1"] + raw["beta1"]
    h = jnp.maximum(h, 0.0)
    y = h @ raw["w2"] + raw["b2"]
    y = (y - raw["rm2"]) / jnp.sqrt(raw["rv2"] + eps) * raw["g2"] + raw["beta2"]
    return jnp.maximum(y, 0.0)


def reference_kernel_math(x, kp, output_size):
    """Same math / casts as the kernel, in plain JAX (tight comparison)."""
    xb = x.astype(jnp.bfloat16)
    h = jnp.dot(xb, kp["w1"], preferred_element_type=jnp.float32) + kp["t1"]
    h = jnp.maximum(h, 0.0)
    y = jnp.dot(h.astype(jnp.bfloat16), kp["w2"],
                preferred_element_type=jnp.float32) + kp["t2"]
    y = jnp.maximum(y, 0.0)
    return y[:, :output_size]


# ----------------------------------------------------------------------------
if __name__ == "__main__":
    key = jax.random.PRNGKey(0)
    k_x, k_p, k_x2 = jax.random.split(key, 3)

    batch, input_size, hidden_size, output_size = 8, 32, 64, 16
    x = jax.random.normal(k_x, (batch, input_size), jnp.float32)

    raw = make_raw_params(k_p, input_size, hidden_size, output_size)
    kparams = fold_and_pad_params(raw)

    out = probes_encoder_forward(x, kparams, output_size)
    out = jax.block_until_ready(out)
    assert out.shape == (batch, output_size)

    # Tight check against a reference using the kernel's exact folding/casts.
    ref_tight = reference_kernel_math(x, kparams, output_size)
    assert jnp.allclose(out, ref_tight, atol=1e-3, rtol=1e-3)

    # Loose check against the un-folded pure-f32 module math (bf16 operands
    # introduce ~0.5% relative error).
    ref_full = reference_f32(x, raw)
    assert jnp.allclose(out, ref_full, atol=5e-2, rtol=5e-2)

    # Second check: batch not divisible by the tile -> exercises the cdiv grid,
    # the masked partial final block, and a multi-step (pipelined) grid.
    n2 = 600
    x2 = jax.random.normal(k_x2, (n2, input_size), jnp.float32)
    out2 = jax.block_until_ready(probes_encoder_forward(x2, kparams, output_size))
    assert out2.shape == (n2, output_size)
    ref2 = reference_kernel_math(x2, kparams, output_size)
    assert jnp.allclose(out2, ref2, atol=1e-3, rtol=1e-3)

    print("KERNEL_OK")
</pallas_src>

<mosaic_0001>
module attributes {stable_mosaic.version = 11 : i64} {
  func.func @_encoder_kernel(%arg0: i32, %arg1: memref<16x32xf32, #tpu.memory_space<vmem>>, %arg2: memref<32x128xbf16, #tpu.memory_space<vmem>>, %arg3: memref<1x128xf32, #tpu.memory_space<vmem>>, %arg4: memref<128x128xbf16, #tpu.memory_space<vmem>>, %arg5: memref<1x128xf32, #tpu.memory_space<vmem>>, %arg6: memref<16x16xf32, #tpu.memory_space<vmem>>) attributes {dimension_semantics = [#tpu.dimension_semantics<parallel>], iteration_bounds = array<i64: 1>, scalar_prefetch = 0 : i64, scratch_operands = 0 : i64, tpu.core_type = #tpu.core_type<tc>, window_params = [{transform_indices = @transform_0, window_bounds = array<i64: 16, 32>}, {pipeline_mode = #tpu.pipeline_mode<synchronous>, transform_indices = @transform_1, window_bounds = array<i64: 32, 128>}, {pipeline_mode = #tpu.pipeline_mode<synchronous>, transform_indices = @transform_2, window_bounds = array<i64: 1, 128>}, {pipeline_mode = #tpu.pipeline_mode<synchronous>, transform_indices = @transform_3, window_bounds = array<i64: 128, 128>}, {pipeline_mode = #tpu.pipeline_mode<synchronous>, transform_indices = @transform_4, window_bounds = array<i64: 1, 128>}, {transform_indices = @transform_5, window_bounds = array<i64: 16, 16>}]} {
    %c0 = arith.constant 0 : index
    %c0_0 = arith.constant 0 : index
    %0 = vector.load %arg1[%c0, %c0_0] : memref<16x32xf32, #tpu.memory_space<vmem>>, vector<16x32xf32>
    %1 = arith.truncf %0 : vector<16x32xf32> to vector<16x32xbf16>
    %c0_1 = arith.constant 0 : index
    %c0_2 = arith.constant 0 : index
    %2 = vector.load %arg2[%c0_1, %c0_2] : memref<32x128xbf16, #tpu.memory_space<vmem>>, vector<32x128xbf16>
    %cst = arith.constant dense<0.000000e+00> : vector<16x128xf32>
    %3 = tpu.matmul %1, %2, %cst {dimension_numbers = #tpu.dot_dimension_numbers<[1], [0], [0], [1], [0, 0, 1, 1], [], []>} : vector<16x32xbf16>, vector<32x128xbf16>, vector<16x128xf32> -> vector<16x128xf32>
    %c0_3 = arith.constant 0 : index
    %c0_4 = arith.constant 0 : index
    %4 = vector.load %arg3[%c0_3, %c0_4] : memref<1x128xf32, #tpu.memory_space<vmem>>, vector<1x128xf32>
    %5 = vector.broadcast %4 : vector<1x128xf32> to vector<16x128xf32>
    %6 = arith.addf %3, %5 : vector<16x128xf32>
    %cst_5 = arith.constant 0.000000e+00 : f32
    %7 = vector.broadcast %cst_5 : f32 to vector<16x128xf32>
    %8 = arith.maximumf %6, %7 : vector<16x128xf32>
    %9 = arith.truncf %8 : vector<16x128xf32> to vector<16x128xbf16>
    %c0_6 = arith.constant 0 : index
    %c0_7 = arith.constant 0 : index
    %10 = vector.load %arg4[%c0_6, %c0_7] : memref<128x128xbf16, #tpu.memory_space<vmem>>, vector<128x128xbf16>
    %cst_8 = arith.constant dense<0.000000e+00> : vector<16x128xf32>
    %11 = tpu.matmul %9, %10, %cst_8 {dimension_numbers = #tpu.dot_dimension_numbers<[1], [0], [0], [1], [0, 0, 1, 1], [], []>} : vector<16x128xbf16>, vector<128x128xbf16>, vector<16x128xf32> -> vector<16x128xf32>
    %c0_9 = arith.constant 0 : index
    %c0_10 = arith.constant 0 : index
    %12 = vector.load %arg5[%c0_9, %c0_10] : memref<1x128xf32, #tpu.memory_space<vmem>>, vector<1x128xf32>
    %13 = vector.broadcast %12 : vector<1x128xf32> to vector<16x128xf32>
    %14 = arith.addf %11, %13 : vector<16x128xf32>
    %cst_11 = arith.constant 0.000000e+00 : f32
    %15 = vector.broadcast %cst_11 : f32 to vector<16x128xf32>
    %16 = arith.maximumf %14, %15 : vector<16x128xf32>
    %17 = vector.extract_strided_slice %16 {offsets = [0, 0], sizes = [16, 16], strides = [1, 1]} : vector<16x128xf32> to vector<16x16xf32>
    %c0_12 = arith.constant 0 : index
    %c0_13 = arith.constant 0 : index
    %18 = vector.load %arg6[%c0_12, %c0_13] : memref<16x16xf32, #tpu.memory_space<vmem>>, vector<16x16xf32>
    tpu.vector_store %arg6[%c0_12, %c0_13], %17 {strides = array<i32>} : memref<16x16xf32, #tpu.memory_space<vmem>>, vector<16x16xf32>,
    return
  }
  func.func @transform_0(%arg0: i32) -> (i32, i32) {
    %c0_i32 = arith.constant 0 : i32
    %c0_i32_0 = arith.constant 0 : i32
    return %arg0, %c0_i32 : i32, i32
  }
  func.func @transform_1(%arg0: i32) -> (i32, i32) {
    %c0_i32 = arith.constant 0 : i32
    %c0_i32_0 = arith.constant 0 : i32
    %c0_i32_1 = arith.constant 0 : i32
    return %c0_i32, %c0_i32_0 : i32, i32
  }
  func.func @transform_2(%arg0: i32) -> (i32, i32) {
    %c0_i32 = arith.constant 0 : i32
    %c0_i32_0 = arith.constant 0 : i32
    %c0_i32_1 = arith.constant 0 : i32
    return %c0_i32, %c0_i32_0 : i32, i32
  }
  func.func @transform_3(%arg0: i32) -> (i32, i32) {
    %c0_i32 = arith.constant 0 : i32
    %c0_i32_0 = arith.constant 0 : i32
    %c0_i32_1 = arith.constant 0 : i32
    return %c0_i32, %c0_i32_0 : i32, i32
  }
  func.func @transform_4(%arg0: i32) -> (i32, i32) {
    %c0_i32 = arith.constant 0 : i32
    %c0_i32_0 = arith.constant 0 : i32
    %c0_i32_1 = arith.constant 0 : i32
    return %c0_i32, %c0_i32_0 : i32, i32
  }
  func.func @transform_5(%arg0: i32) -> (i32, i32) {
    %c0_i32 = arith.constant 0 : i32
    %c0_i32_0 = arith.constant 0 : i32
    return %arg0, %c0_i32 : i32, i32
  }
}

</mosaic_0001>

<bundles_post_ra>
// kernel: tpu_custom_call.1
= control target key start
LH: loop header
LB: loop body
LE: loop exit
PB: predicated region body
PF: predicated region fallthrough
CT: control target
= control target key end

     0   :  { %10 = vsyncpa [#allocation3], 0  ;;  %s501_s0 = inlined_call_operand.hbm [shape: f32[8,32], index: 0, kind: input, shape index: {}]   ;;  %s502_s1 = inlined_call_operand.hbm [shape: bf16[32,128], index: 1, kind: input, shape index: {}]   ;;  %s503_s2 = inlined_call_operand.vmem [shape: f32[1,128], index: 2, kind: input, shape index: {}]   ;;  %s504_s3 = inlined_call_operand.hbm [shape: bf16[128,128], index: 3, kind: input, shape index: {}]   ;;  %s505_s4 = inlined_call_operand.vmem [shape: f32[1,128], index: 4, kind: input, shape index: {}]   ;;  %s506_s5 = inlined_call_operand.hbm [shape: f32[8,16], index: 5, kind: output, shape index: {}]  }
   0x1   :  { %11 = vsyncpa [#allocation6], 0 }
   0x2   :  { %12 = vsyncpa [#allocation4], 0 }
   0x3   :  { %17 = vsyncadd [#allocation3], 128  ;;  %s431_s18 = smov [#allocation5]  }
   0x4   :  { %s30_s19 = sshll.u32 %s431_s18, 4  ;;  %s31_s19 = int_to_ptr.vmem [resolvable:$true] %s30_s19 }
   0x5   :  { %s353_s20 = scalar_lea.vmem %s31_s19, 256  ;;  %p358_p1 = scmp.lt.s32.totalorder %s31_s19, %s31_s19 }
   0x6   :  { %p354_p0 = scmp.ne.s32.totalorder %s31_s19, %s353_s20  ;;  %p359_p2 = scmp.lt.s32.totalorder %s353_s20, %s353_s20 }
   0x8   :  { %p360_p3 = por %p359_p2, %p358_p1 }
   0xa   :  { %p361_p4 = pnand %p360_p3, %p354_p0 }
   0xc   :  { %364 = shalt.err (!%p361_p4)
}
   0xd   :  { %s432_s21 = smov 64   ;;  %s433_s22 = smov 4  }
   0xe   :  { %36 = dma.hbm_to_vmem [thread:$0]  %s502_s1, 256, %s31_s19, [#allocation6], %s432_s21, %s432_s21, %s433_s22  }
   0xf   :  { %s434_s25 = smov [#allocation2]  }
  0x10   :  { %s18_s26 = sshll.u32 %s434_s25, 4  ;;  %s19_s26 = int_to_ptr.vmem [resolvable:$true] %s18_s26 }
  0x11   :  { %s373_s27 = scalar_lea.vmem %s19_s26, 128  ;;  %s377_s28 = scalar_lea.vmem %s19_s26, 256 }
  0x12   :  { %p374_p5 = scmp.ne.s32.totalorder %s19_s26, %s373_s27  ;;  %p378_p6 = scmp.lt.s32.totalorder %s19_s26, %s19_s26 }
  0x13   :  { %p379_p7 = scmp.lt.s32.totalorder %s377_s28, %s373_s27 }
  0x15   :  { %p380_p8 = por %p379_p7, %p378_p6 }
  0x17   :  { %p381_p9 = pnand %p380_p8, %p374_p5 }
  0x19   :  { %384 = shalt.err (!%p381_p9)
}
  0x1a   :  { %s435_s29 = smov 128   ;;  %s436_s30 = smov 8  }
  0x1b   :  { %24 = dma.hbm_to_vmem [thread:$0]  %s501_s0, 128, %s19_s26, [#allocation3], %s435_s29, %s435_s29, %s436_s30  }
  0x1c   :  { %s437_s1 = smov [#allocation7]  }
  0x1d   :  { %s44_s8 = sshll.u32 %s437_s1, 4  ;;  %s45_s8 = int_to_ptr.vmem [resolvable:$true] %s44_s8 }
  0x1e   :  { %s393_s9 = scalar_lea.vmem %s45_s8, 1024  ;;  %p398_p11 = scmp.lt.s32.totalorder %s45_s8, %s45_s8 }
  0x1f   :  { %p394_p10 = scmp.ne.s32.totalorder %s45_s8, %s393_s9  ;;  %p399_p12 = scmp.lt.s32.totalorder %s393_s9, %s393_s9 }
  0x21   :  { %p400_p13 = por %p399_p12, %p398_p11 }
  0x23   :  { %p401_p0 = pnand %p400_p13, %p394_p10 }
  0x25   :  { %404 = shalt.err (!%p401_p0)
}
  0x26   :  { %50 = dma.hbm_to_vmem [thread:$0]  %s504_s3, 1024, %s45_s8, [#allocation6], %s432_s21, %s432_s21, %s433_s22  }
  0x27   :  { %425 = dma.done.wait [#allocation3], 256  }
  0x28   :  { %426 = vsyncadd [#allocation3], 4294967040 }
  0x29   :  { %427 = dma.done.wait [#allocation6], 1280  }
  0x2a   :  { %428 = vsyncadd [#allocation6], 4294966016  ;;  %v438_v0 = vmov 0.0   ;;  %vm439_vm0 = vmmov 0   ;;  %v335_v1 = vld [vmem:[#allocation5 + $0x8] sm:$0xff]   ;;  %v336_v2 = vld [vmem:[#allocation5] sm:$0xff]  }
  0x2b   :  { %297 = vmatprep.subr.bf16.mxu0 %v438_v0  ;;  %301 = vmatprep.mubr.msk.bf16.mxu0 %vm439_vm0, %v438_v0  ;;  %v63_v3 = vld [vmem:[#allocation2] sm:$0xff]  ;;  %v64_v4 = vld [vmem:[#allocation2 + $0x8] sm:$0xff]  ;;  %v337_v5 = vld [vmem:[#allocation7 + $0x38] sm:$0xff]   ;;  %vm89_vm1 = vcmask 261120   ;;  %vm251_vm2 = vcmask 130048  }
  0x2c   :  { %305 = vmatprep.subr.bf16.mxu1 %v438_v0  ;;  %321 = vmatprep.mubr.msk.bf16.mxu1 %vm439_vm0, %v438_v0  ;;  %v65_v6 = vpack.c.bf16 %v64_v4, %v63_v3  ;;  %v338_v7 = vld [vmem:[#allocation7 + $0x30] sm:$0xff]   ;;  %v339_v8 = vld [vmem:[#allocation7 + $0x28] sm:$0xff]   ;;  %v340_v9 = vld [vmem:[#allocation7 + $0x20] sm:$0xff]  }
  0x2d   :  { %298 = vmatpush3.bf16.msra.mxu0 %v335_v1  ;;  %306 = vmatpush3.bf16.msra.mxu1 %v337_v5  ;;  %v341_v10 = vld [vmem:[#allocation7 + $0x18] sm:$0xff]   ;;  %v342_v11 = vld [vmem:[#allocation7 + $0x10] sm:$0xff]   ;;  %v343_v12 = vld [vmem:[#allocation7 + $0x8] sm:$0xff]  }
  0x2e   :  { %299 = vmatprep.subr.bf16.mxu0 %v438_v0  ;;  %307 = vmatprep.subr.bf16.mxu1 %v438_v0  ;;  %v344_v13 = vld [vmem:[#allocation7] sm:$0xff]  }
  0x2f   :  { %v272_v14 = vld [vmem:[%s503_s2] ss:$0 sm:$0xff] }
  0x30   :  { %v276_v24 = vld [vmem:[%s505_s4] ss:$0 sm:$0xff] }
  0x31   :  { %300 = vmatpush3.bf16.msra.mxu0 %v336_v2  ;;  %308 = vmatpush3.bf16.msra.mxu1 %v338_v7 }
  0x32   :  { %309 = vmatprep.subr.bf16.mxu1 %v438_v0 }
  0x34   :  { %302 = vmatmul.mubr.msk.bf16.vlgmr.msra.gmra.mxu0 %vm89_vm1, %v65_v6 }
  0x35   :  { %310 = vmatpush3.bf16.msra.mxu1 %v339_v8 }
  0x36   :  { %311 = vmatprep.subr.bf16.mxu1 %v438_v0 }
  0x39   :  { %312 = vmatpush3.bf16.msra.mxu1 %v340_v9 }
  0x3a   :  { %313 = vmatprep.subr.bf16.mxu1 %v438_v0 }
  0x3d   :  { %314 = vmatpush3.bf16.msra.mxu1 %v341_v10 }
  0x3e   :  { %315 = vmatprep.subr.bf16.mxu1 %v438_v0 }
  0x41   :  { %316 = vmatpush3.bf16.msra.mxu1 %v342_v11 }
  0x42   :  { %317 = vmatprep.subr.bf16.mxu1 %v438_v0 }
  0x45   :  { %318 = vmatpush3.bf16.msra.mxu1 %v343_v12 }
  0x46   :  { %319 = vmatprep.subr.bf16.mxu1 %v438_v0 }
  0x49   :  { %320 = vmatpush3.bf16.msra.mxu1 %v344_v13 }
  0xf4   :  { %v127_v15 = vpop.f32.mrf.mxu0 }
  0xf5   :  { %v128_v17 = vadd.f32 %v272_v14, %v127_v15 }
  0xf6   :  { %v303_v16 = vpop.f32.mrf.mxu0 }
  0xf7   :  { %v134_v21 = vmax.f32 %v128_v17, 0.0 }
  0xf8   :  { %v130_v18 = vpop.f32.mrf.mxu0 }
  0xf9   :  { %v131_v19 = vadd.f32 %v272_v14, %v130_v18 }
  0xfa   :  { %v304_v20 = vpop.f32.mrf.mxu0 }
  0xfb   :  { %v135_v22 = vmax.f32 %v131_v19, 0.0 }
  0xfd   :  { %v136_v23 = vpack.c.bf16 %v135_v22, %v134_v21 }
  0xff   :  { %322 = vmatmul.mubr.bf16.vlgmr.msra.gmra.mxu1 %v136_v23 }
 0x1bf   :  { %v242_v25 = vpop.f32.mrf.mxu1 }
 0x1c0   :  { %v243_v26 = vadd.f32 %v276_v24, %v242_v25 }
 0x1c1   :  { %v323_v27 = vpop.f32.mrf.mxu1 }
 0x1c2   :  { %v249_v28 = vmax.f32 %v243_v26, 0.0 }
 0x1c3   :  { %v245_v29 = vpop.f32.mrf.mxu1 }
 0x1c4   :  { %252 = vst.msk [vmem:[#allocation8] sm:$0xff] %vm251_vm2, %v249_v28  ;;  %v246_v30 = vadd.f32 %v276_v24, %v245_v29 }
 0x1c5   :  { %v324_v31 = vpop.f32.mrf.mxu1 }
 0x1c6   :  { %v250_v32 = vmax.f32 %v246_v30, 0.0 }
 0x1c8   :  { %253 = vst.msk [vmem:[#allocation8 + $0x8] sm:$0xff] %vm251_vm2, %v250_v32 }
 0x1c9   :  { %258 = vsyncadd [#allocation4], 128  ;;  %s440_s2 = smov [#allocation8]  }
 0x1ca   :  { %s259_s14 = sshll.u32 %s440_s2, 4  ;;  %s260_s14 = int_to_ptr.vmem [resolvable:$true] %s259_s14 }
 0x1cb   :  { %s405_s15 = scalar_lea.vmem %s260_s14, 128  ;;  %s409_s16 = scalar_lea.vmem %s260_s14, 256 }
 0x1cc   :  { %p406_p1 = scmp.ne.s32.totalorder %s260_s14, %s405_s15  ;;  %p410_p2 = scmp.lt.s32.totalorder %s260_s14, %s260_s14 }
 0x1cd   :  { %p411_p3 = scmp.lt.s32.totalorder %s409_s16, %s405_s15 }
 0x1cf   :  { %p412_p4 = por %p411_p3, %p410_p2 }
 0x1d1   :  { %p413_p5 = pnand %p412_p4, %p406_p1 }
 0x1d3   :  { %416 = shalt.err (!%p413_p5)
}
 0x1d4   :  { %265 = dma.vmem_to_hbm [thread:$0]  %s260_s14, 128, %s506_s5, [#allocation4], %s435_s29, %s435_s29, %s436_s30  }
 0x1d5   :  { %429 = dma.done.wait [#allocation4], 256  }
 0x1d6   :  { %430 = vsyncadd [#allocation4], 4294967040 }
 0x1d7   :  { %269 = vsyncpa [#allocation3], 1 }
 0x1d8   :  { %270 = vsyncpa [#allocation6], 1 }
 0x1d9   :  { %271 = vsyncpa [#allocation4], 1 }

</bundles_post_ra>
